<compile_context>
chip_gen: v7x
topology: tpu7x:2x2x1
jax: 0.10.0
libtpu: 0.0.40
codegen_flags: <defaults>
</compile_context>

<pallas_src>
import jax
import jax.numpy as jnp
from jax.experimental import pallas as pl
from jax.experimental.pallas import tpu as pltpu


HIDDEN = 64   # true hidden width of the torch module
HP = 128      # padded, MXU/lane-friendly hidden width used inside the kernel


def _round_up(x, m):
    return ((x + m - 1) // m) * m


def critic_kernel(x_ref, wa_ref, w2_ref, w3_ref, o_ref):
    # Fused layer-1 matmul on the packed, transposed activations:
    #   rows   0:128  -> s @ W1 + b1          (h1 pre-activation)
    #   rows 128:256  -> a @ W2a + b2         (layer-2 action/bias term)
    u = jnp.dot(wa_ref[...], x_ref[...], preferred_element_type=jnp.float32)   # (256, tb)

    h1 = jnp.maximum(u[:HP, :], 0.0)                                            # (128, tb)

    # Layer 2: relu(W2s^T @ h1 + (a @ W2a + b2)).  Hidden rows >= 64 stay 0
    # because the corresponding weight rows are exactly zero.
    h2 = jnp.dot(w2_ref[...], h1, preferred_element_type=jnp.float32) + u[HP:, :]
    h2 = jnp.maximum(h2, 0.0)                                                   # (128, tb)

    # Output layer (without b3): row 0 of w3_ref holds W3[:, 0], rows 1..7 are
    # zero.  Result row 0 is (q - b3), already lane-dense over the batch.
    q8 = jnp.dot(w3_ref[...], h2, preferred_element_type=jnp.float32)           # (8, tb)
    o_ref[...] = q8[0:1, :]


def prepare_kernel_params(params, nb_status, nb_actions, f_pad):
    """Pack the Critic parameters ([in, out] layout) into the kernel layout.

      WA  [256, F]:  rows   0:64  = W1^T, with b1 in the constant-one column
                     rows 128:192 = (W2 action half)^T, with b2 in the
                                    constant-one column
      W2T [128,128]: rows/cols 0:64 = (W2 h1 half)^T
      W3M [8, 128]:  row 0 = W3[:, 0]         (b3 is added in the wrapper)

    All padded rows / columns are exactly zero by construction, so the padded
    hidden rows and padded feature columns contribute nothing.
    """
    w1, b1, w2, b2, w3, b3 = params
    ns, na = nb_status, nb_actions
    one_col = ns + na                       # index of the constant-one feature
    f32 = jnp.float32

    wa = jnp.zeros((2 * HP, f_pad), f32)
    wa = wa.at[:HIDDEN, :ns].set(w1.T)
    wa = wa.at[:HIDDEN, one_col].set(b1)
    wa = wa.at[HP:HP + HIDDEN, ns:ns + na].set(w2[HIDDEN:].T)
    wa = wa.at[HP:HP + HIDDEN, one_col].set(b2)

    w2t = jnp.zeros((HP, HP), f32).at[:HIDDEN, :HIDDEN].set(w2[:HIDDEN].T)

    w3m = jnp.zeros((8, HP), f32).at[0, :HIDDEN].set(w3[:, 0])

    return wa, w2t, w3m, b3.astype(f32)


def critic_forward(s, a, params, *, tb=4096):
    """Full Critic forward pass in a single batch-tiled Pallas kernel.

    `params` are the unpadded (PyTorch-equivalent, [in, out]-layout)
    parameters from init_critic_params; packing into the transposed,
    bias-folded kernel layout happens here.
    """
    # Mirror the PyTorch 1-D -> [1, -1] handling.
    s = jnp.atleast_2d(jnp.asarray(s, jnp.float32))
    a = jnp.atleast_2d(jnp.asarray(a, jnp.float32))
    assert s.shape[0] == a.shape[0]
    B = s.shape[0]
    ns, na = s.shape[1], a.shape[1]
    F = _round_up(ns + na + 1, 8)   # +1 = constant-one feature (b1/b2 fold)

    wa, w2t, w3m, b3 = prepare_kernel_params(params, ns, na, F)

    # ---- batch tile selection --------------------------------------------
    # Lane-dense tiles (multiple of 128); large default since per-step
    # pipeline overhead dominates small tiles; clamp so the grid has >= 2
    # steps whenever possible (v7x megacore); tiny batches use one 128 tile.
    tb = max(128, (int(tb) // 128) * 128)
    tb = min(tb, max(128, _round_up(pl.cdiv(B, 2), 128)))
    Bp = _round_up(B, tb)

    # One packed, transposed activation stream: (F, Bp), batch on the lanes.
    x = jnp.concatenate([s, a, jnp.ones((B, 1), jnp.float32)], axis=1)
    x = jnp.pad(x, ((0, Bp - B), (0, F - x.shape[1])))
    xt = x.T

    grid = (Bp // tb,)

    out = pl.pallas_call(
        critic_kernel,
        out_shape=jax.ShapeDtypeStruct((1, Bp), jnp.float32),
        grid=grid,
        in_specs=[
            pl.BlockSpec((F, tb), lambda i: (0, i)),       # activations (pipelined)
            pl.BlockSpec((2 * HP, F), lambda i: (0, 0)),   # fused layer-1 weights
            pl.BlockSpec((HP, HP), lambda i: (0, 0)),      # layer-2 (h1 half) weights
            pl.BlockSpec((8, HP), lambda i: (0, 0)),       # output row W3
        ],
        out_specs=pl.BlockSpec((1, tb), lambda i: (0, i)),
        compiler_params=pltpu.CompilerParams(
            dimension_semantics=("parallel",),
            vmem_limit_bytes=32 * 1024 * 1024),
    )(xt, wa, w2t, w3m)

    # Drop the batch padding; add the scalar output bias exactly in f32.
    return out[0, :B][:, None] + b3


def init_critic_params(key, nb_status, nb_actions, init_w=3e-4):
    """nn.Linear default init (U(-1/sqrt(fan_in), +1/sqrt(fan_in))) with
    Critic.init_weights overriding fc2.weight to U(-init_w, init_w)."""
    k = jax.random.split(key, 6)

    def uni(k_, shape, bound):
        return jax.random.uniform(k_, shape, jnp.float32, -bound, bound)

    bnd1 = 1.0 / (nb_status ** 0.5)
    w1 = uni(k[0], (nb_status, HIDDEN), bnd1)
    b1 = uni(k[1], (HIDDEN,), bnd1)

    bnd2 = 1.0 / ((HIDDEN + nb_actions) ** 0.5)
    w2 = uni(k[2], (HIDDEN + nb_actions, HIDDEN), bnd2)
    b2 = uni(k[3], (HIDDEN,), bnd2)

    bnd3 = 1.0 / (HIDDEN ** 0.5)
    w3 = uni(k[4], (HIDDEN, 1), init_w)   # fc2.weight ~ U(-init_w, init_w)
    b3 = uni(k[5], (1,), bnd3)            # fc2.bias keeps the default init

    return (w1, b1, w2, b2, w3, b3)


def critic_ref(s, a, params):
    """Pure-JAX reference (unpadded params) for correctness checks."""
    w1, b1, w2, b2, w3, b3 = params
    s = jnp.atleast_2d(s)
    a = jnp.atleast_2d(a)
    h1 = jnp.maximum(s @ w1 + b1, 0.0)
    h2 = jnp.maximum(jnp.concatenate([h1, a], axis=1) @ w2 + b2, 0.0)
    return h2 @ w3 + b3


if __name__ == "__main__":
    key = jax.random.PRNGKey(0)
    k_s, k_a, k_p, k_s2, k_a2 = jax.random.split(key, 5)

    nb_status, nb_actions = 8, 4
    params = init_critic_params(k_p, nb_status, nb_actions)

    # Small smoke test (batch=2).
    batch = 2
    s = jax.random.normal(k_s, (batch, nb_status), jnp.float32)
    a = jax.random.normal(k_a, (batch, nb_actions), jnp.float32)
    q = jax.block_until_ready(critic_forward(s, a, params))
    q_ref = critic_ref(s, a, params)
    assert q.shape == (batch, 1), q.shape
    assert jnp.allclose(q, q_ref, atol=1e-4, rtol=1e-4), (q, q_ref)

    # Multi-tile test with a ragged batch (exercises the >=2-step grid,
    # batch padding and lane-dense output path).
    batch2 = 1030
    s2 = jax.random.normal(k_s2, (batch2, nb_status), jnp.float32)
    a2 = jax.random.normal(k_a2, (batch2, nb_actions), jnp.float32)
    q2 = jax.block_until_ready(critic_forward(s2, a2, params))
    q2_ref = critic_ref(s2, a2, params)
    assert q2.shape == (batch2, 1), q2.shape
    assert jnp.allclose(q2, q2_ref, atol=1e-4, rtol=1e-4)

    print("KERNEL_OK")
</pallas_src>

<mosaic_0001>
module attributes {stable_mosaic.version = 11 : i64} {
  func.func @critic_kernel(%arg0: i32, %arg1: memref<16x128xf32, #tpu.memory_space<vmem>>, %arg2: memref<256x16xf32, #tpu.memory_space<vmem>>, %arg3: memref<128x128xf32, #tpu.memory_space<vmem>>, %arg4: memref<8x128xf32, #tpu.memory_space<vmem>>, %arg5: memref<1x128xf32, #tpu.memory_space<vmem>>) attributes {dimension_semantics = [#tpu.dimension_semantics<parallel>], iteration_bounds = array<i64: 1>, scalar_prefetch = 0 : i64, scratch_operands = 0 : i64, tpu.core_type = #tpu.core_type<tc>, window_params = [{transform_indices = @transform_0, window_bounds = array<i64: 16, 128>}, {pipeline_mode = #tpu.pipeline_mode<synchronous>, transform_indices = @transform_1, window_bounds = array<i64: 256, 16>}, {pipeline_mode = #tpu.pipeline_mode<synchronous>, transform_indices = @transform_2, window_bounds = array<i64: 128, 128>}, {pipeline_mode = #tpu.pipeline_mode<synchronous>, transform_indices = @transform_3, window_bounds = array<i64: 8, 128>}, {transform_indices = @transform_4, window_bounds = array<i64: 1, 128>}]} {
    %c0 = arith.constant 0 : index
    %c0_0 = arith.constant 0 : index
    %0 = vector.load %arg2[%c0, %c0_0] : memref<256x16xf32, #tpu.memory_space<vmem>>, vector<256x16xf32>
    %c0_1 = arith.constant 0 : index
    %c0_2 = arith.constant 0 : index
    %1 = vector.load %arg1[%c0_1, %c0_2] : memref<16x128xf32, #tpu.memory_space<vmem>>, vector<16x128xf32>
    %cst = arith.constant dense<0.000000e+00> : vector<256x128xf32>
    %2 = tpu.matmul %0, %1, %cst {dimension_numbers = #tpu.dot_dimension_numbers<[1], [0], [0], [1], [0, 0, 1, 1], [], []>} : vector<256x16xf32>, vector<16x128xf32>, vector<256x128xf32> -> vector<256x128xf32>
    %3 = vector.extract_strided_slice %2 {offsets = [0, 0], sizes = [128, 128], strides = [1, 1]} : vector<256x128xf32> to vector<128x128xf32>
    %cst_3 = arith.constant 0.000000e+00 : f32
    %4 = vector.broadcast %cst_3 : f32 to vector<128x128xf32>
    %5 = arith.maximumf %3, %4 : vector<128x128xf32>
    %c0_4 = arith.constant 0 : index
    %c0_5 = arith.constant 0 : index
    %6 = vector.load %arg3[%c0_4, %c0_5] : memref<128x128xf32, #tpu.memory_space<vmem>>, vector<128x128xf32>
    %cst_6 = arith.constant dense<0.000000e+00> : vector<128x128xf32>
    %7 = tpu.matmul %6, %5, %cst_6 {dimension_numbers = #tpu.dot_dimension_numbers<[1], [0], [0], [1], [0, 0, 1, 1], [], []>} : vector<128x128xf32>, vector<128x128xf32>, vector<128x128xf32> -> vector<128x128xf32>
    %8 = vector.extract_strided_slice %2 {offsets = [128, 0], sizes = [128, 128], strides = [1, 1]} : vector<256x128xf32> to vector<128x128xf32>
    %9 = arith.addf %7, %8 : vector<128x128xf32>
    %cst_7 = arith.constant 0.000000e+00 : f32
    %10 = vector.broadcast %cst_7 : f32 to vector<128x128xf32>
    %11 = arith.maximumf %9, %10 : vector<128x128xf32>
    %c0_8 = arith.constant 0 : index
    %c0_9 = arith.constant 0 : index
    %12 = vector.load %arg4[%c0_8, %c0_9] : memref<8x128xf32, #tpu.memory_space<vmem>>, vector<8x128xf32>
    %cst_10 = arith.constant dense<0.000000e+00> : vector<8x128xf32>
    %13 = tpu.matmul %12, %11, %cst_10 {dimension_numbers = #tpu.dot_dimension_numbers<[1], [0], [0], [1], [0, 0, 1, 1], [], []>} : vector<8x128xf32>, vector<128x128xf32>, vector<8x128xf32> -> vector<8x128xf32>
    %14 = vector.extract_strided_slice %13 {offsets = [0, 0], sizes = [1, 128], strides = [1, 1]} : vector<8x128xf32> to vector<1x128xf32>
    %c0_11 = arith.constant 0 : index
    %c0_12 = arith.constant 0 : index
    %15 = vector.load %arg5[%c0_11, %c0_12] : memref<1x128xf32, #tpu.memory_space<vmem>>, vector<1x128xf32>
    tpu.vector_store %arg5[%c0_11, %c0_12], %14 {strides = array<i32>} : memref<1x128xf32, #tpu.memory_space<vmem>>, vector<1x128xf32>,
    return
  }
  func.func @transform_0(%arg0: i32) -> (i32, i32) {
    %c0_i32 = arith.constant 0 : i32
    %c0_i32_0 = arith.constant 0 : i32
    return %c0_i32, %arg0 : i32, i32
  }
  func.func @transform_1(%arg0: i32) -> (i32, i32) {
    %c0_i32 = arith.constant 0 : i32
    %c0_i32_0 = arith.constant 0 : i32
    %c0_i32_1 = arith.constant 0 : i32
    return %c0_i32, %c0_i32_0 : i32, i32
  }
  func.func @transform_2(%arg0: i32) -> (i32, i32) {
    %c0_i32 = arith.constant 0 : i32
    %c0_i32_0 = arith.constant 0 : i32
    %c0_i32_1 = arith.constant 0 : i32
    return %c0_i32, %c0_i32_0 : i32, i32
  }
  func.func @transform_3(%arg0: i32) -> (i32, i32) {
    %c0_i32 = arith.constant 0 : i32
    %c0_i32_0 = arith.constant 0 : i32
    %c0_i32_1 = arith.constant 0 : i32
    return %c0_i32, %c0_i32_0 : i32, i32
  }
  func.func @transform_4(%arg0: i32) -> (i32, i32) {
    %c0_i32 = arith.constant 0 : i32
    %c0_i32_0 = arith.constant 0 : i32
    return %c0_i32, %arg0 : i32, i32
  }
}

</mosaic_0001>

<bundles_post_ra>
// kernel: tpu_custom_call.1
= control target key start
LH: loop header
LB: loop body
LE: loop exit
PB: predicated region body
PF: predicated region fallthrough
CT: control target
= control target key end

     0   :  { %vm52_vm0 = vcmask 130048   ;;  %s1257_s0 = inlined_call_operand.vmem [shape: f32[16,128], index: 0, kind: input, shape index: {}]   ;;  %s1258_s1 = inlined_call_operand.vmem [shape: f32[256,16], index: 1, kind: input, shape index: {}]   ;;  %s1259_s2 = inlined_call_operand.vmem [shape: f32[128,128], index: 2, kind: input, shape index: {}]   ;;  %s1260_s3 = inlined_call_operand.vmem [shape: f32[8,128], index: 3, kind: input, shape index: {}]   ;;  %s1261_s4 = inlined_call_operand.hbm [shape: f32[1,128], index: 4, kind: output, shape index: {}]  }
   0x1   :  { %v50_v0 = vld [vmem:[%s1257_s0] sm:$0xff]  ;;  %v51_v1 = vld [vmem:[%s1257_s0 + $0x8] sm:$0xff]  ;;  %v20_v5 = vld [vmem:[%s1258_s1 + $0x10] sm:$0xff] }
   0x2   :  { %v18_v2 = vld [vmem:[%s1258_s1] sm:$0xff]  ;;  %v911_v3 = vpack.c.bf16 %v51_v1, %v50_v0  ;;  %v19_v4 = vld [vmem:[%s1258_s1 + $0x8] sm:$0xff] }
   0x3   :  { %772 = vmatprep.mubr.msk.f32.mxu0 %vm52_vm0, %v18_v2 }
   0x4   :  { %912 = vmatprep.subr.bf16.mxu0 %v911_v3  ;;  %971 = vmatprep.subr.bf16.mxu1 %v911_v3 }
   0x5   :  { %914 = vmatpush3.bf16.msra.mxu0 %v911_v3  ;;  %972 = vmatpush3.bf16.msra.mxu1 %v911_v3 }
   0x6   :  { %9 = vsyncpa [#allocation3], 0  ;;  %v21_v6 = vld [vmem:[%s1258_s1 + $0x18] sm:$0xff]  ;;  %v22_v7 = vld [vmem:[%s1258_s1 + $0x20] sm:$0xff]  ;;  %vm1018_vm1 = vmmov 0   ;;  %s1020_s6 = smov [#allocation2]  }
   0x7   :  { %v23_v8 = vld [vmem:[%s1258_s1 + $0x28] sm:$0xff]  ;;  %v24_v9 = vld [vmem:[%s1258_s1 + $0x30] sm:$0xff]  ;;  %v25_v10 = vld [vmem:[%s1258_s1 + $0x38] sm:$0xff]  ;;  %s645_s7 = sshll.u32 %s1020_s6, 4  ;;  %s646_s7 = int_to_ptr.vmem [resolvable:$true] %s645_s7 }
   0x8   :  { %773 = vmatmul.mubr.msk.f32.vlgmr.msra.gmra.mrb[0].mxu0 %vm52_vm0, %v19_v4  ;;  %v26_v11 = vld [vmem:[%s1258_s1 + $0x40] sm:$0xff]  ;;  %v27_v12 = vld [vmem:[%s1258_s1 + $0x48] sm:$0xff]  ;;  %v28_v13 = vld [vmem:[%s1258_s1 + $0x50] sm:$0xff]  ;;  %s993_s8 = scalar_lea.vmem %s646_s7, 16  ;;  %s997_s9 = scalar_lea.vmem %s646_s7, 32 }
   0x9   :  { %775 = vmatprep.mubr.msk.f32.mxu0 %vm52_vm0, %v20_v5  ;;  %v29_v14 = vld [vmem:[%s1258_s1 + $0x58] sm:$0xff]  ;;  %v30_v15 = vld [vmem:[%s1258_s1 + $0x60] sm:$0xff]  ;;  %v31_v16 = vld [vmem:[%s1258_s1 + $0x68] sm:$0xff]  ;;  %p994_p0 = scmp.ne.s32.totalorder %s646_s7, %s993_s8  ;;  %p998_p1 = scmp.lt.s32.totalorder %s646_s7, %s646_s7 }
   0xa   :  { %v32_v17 = vld [vmem:[%s1258_s1 + $0x70] sm:$0xff]  ;;  %v33_v18 = vld [vmem:[%s1258_s1 + $0x78] sm:$0xff]  ;;  %v34_v19 = vld [vmem:[%s1258_s1 + $0x80] sm:$0xff]  ;;  %p999_p2 = scmp.lt.s32.totalorder %s997_s9, %s993_s8 }
   0xb   :  { %v35_v20 = vld [vmem:[%s1258_s1 + $0x88] sm:$0xff]  ;;  %v390_v21 = vld [vmem:[%s1259_s2] sm:$0xff]  ;;  %796 = vmatprep.mubr.msk.f32.mxu1 %vm52_vm0, %v34_v19  ;;  %v36_v22 = vld [vmem:[%s1258_s1 + $0x90] sm:$0xff] }
   0xc   :  { %776 = vmatmul.mubr.msk.f32.gmra.mrb[2].mxu0 %vm52_vm0, %v21_v6  ;;  %797 = vmatmul.mubr.msk.f32.vlgmr.msra.gmra.mrb[0].mxu1 %vm52_vm0, %v35_v20  ;;  %v37_v23 = vld [vmem:[%s1258_s1 + $0x98] sm:$0xff]  ;;  %v38_v24 = vld [vmem:[%s1258_s1 + $0xa0] sm:$0xff]  ;;  %v39_v25 = vld [vmem:[%s1258_s1 + $0xa8] sm:$0xff]  ;;  %p1000_p3 = por %p999_p2, %p998_p1 }
   0xd   :  { %778 = vmatprep.mubr.msk.f32.mxu0 %vm52_vm0, %v22_v7  ;;  %799 = vmatprep.mubr.msk.f32.mxu1 %vm52_vm0, %v36_v22  ;;  %v40_v26 = vld [vmem:[%s1258_s1 + $0xb0] sm:$0xff]  ;;  %v41_v27 = vld [vmem:[%s1258_s1 + $0xb8] sm:$0xff]  ;;  %v42_v28 = vld [vmem:[%s1258_s1 + $0xc0] sm:$0xff] }
   0xe   :  { %v43_v29 = vld [vmem:[%s1258_s1 + $0xc8] sm:$0xff]  ;;  %v44_v30 = vld [vmem:[%s1258_s1 + $0xd0] sm:$0xff]  ;;  %v45_v31 = vld [vmem:[%s1258_s1 + $0xd8] sm:$0xff]  ;;  %p1001_p4 = pnand %p1000_p3, %p994_p0 }
   0xf   :  { %v46_v32 = vld [vmem:[%s1258_s1 + $0xe0] sm:$0xff]  ;;  %v47_v33 = vld [vmem:[%s1258_s1 + $0xe8] sm:$0xff]  ;;  %v48_v34 = vld [vmem:[%s1258_s1 + $0xf0] sm:$0xff] }
  0x10   :  { %779 = vmatmul.mubr.msk.f32.gmra.mrb[4].mxu0 %vm52_vm0, %v23_v8  ;;  %800 = vmatmul.mubr.msk.f32.gmra.mrb[2].mxu1 %vm52_vm0, %v37_v23  ;;  %v49_v35 = vld [vmem:[%s1258_s1 + $0xf8] sm:$0xff]  ;;  %v398_v19 = vld [vmem:[%s1259_s2 + $0x40] sm:$0xff]  ;;  %v399_v20 = vld [vmem:[%s1259_s2 + $0x48] sm:$0xff] }
  0x11   :  { %781 = vmatprep.mubr.msk.f32.mxu0 %vm52_vm0, %v24_v9  ;;  %802 = vmatprep.mubr.msk.f32.mxu1 %vm52_vm0, %v38_v24  ;;  %v401_v22 = vld [vmem:[%s1259_s2 + $0x58] sm:$0xff]  ;;  %v402_v23 = vld [vmem:[%s1259_s2 + $0x60] sm:$0xff]  ;;  %v403_v24 = vld [vmem:[%s1259_s2 + $0x68] sm:$0xff] }
  0x14   :  { %782 = vmatmul.mubr.msk.f32.gmra.mrb[6].mxu0 %vm52_vm0, %v25_v10  ;;  %803 = vmatmul.mubr.msk.f32.gmra.mrb[4].mxu1 %vm52_vm0, %v39_v25  ;;  %v404_v25 = vld [vmem:[%s1259_s2 + $0x70] sm:$0xff] }
  0x15   :  { %784 = vmatprep.mubr.msk.f32.mxu0 %vm52_vm0, %v26_v11  ;;  %805 = vmatprep.mubr.msk.f32.mxu1 %vm52_vm0, %v40_v26  ;;  %v405_v26 = vld [vmem:[%s1259_s2 + $0x78] sm:$0xff] }
  0x18   :  { %785 = vmatmul.mubr.msk.f32.gmra.mrb[8].mxu0 %vm52_vm0, %v27_v12  ;;  %806 = vmatmul.mubr.msk.f32.gmra.mrb[6].mxu1 %vm52_vm0, %v41_v27  ;;  %v391_v12 = vld [vmem:[%s1259_s2 + $0x8] sm:$0xff] }
  0x19   :  { %787 = vmatprep.mubr.msk.f32.mxu0 %vm52_vm0, %v28_v13  ;;  %808 = vmatprep.mubr.msk.f32.mxu1 %vm52_vm0, %v42_v28  ;;  %v392_v13 = vld [vmem:[%s1259_s2 + $0x10] sm:$0xff] }
  0x1c   :  { %788 = vmatmul.mubr.msk.f32.gmra.mrb[10].mxu0 %vm52_vm0, %v29_v14  ;;  %809 = vmatmul.mubr.msk.f32.gmra.mrb[8].mxu1 %vm52_vm0, %v43_v29  ;;  %v393_v14 = vld [vmem:[%s1259_s2 + $0x18] sm:$0xff] }
  0x1d   :  { %790 = vmatprep.mubr.msk.f32.mxu0 %vm52_vm0, %v30_v15  ;;  %811 = vmatprep.mubr.msk.f32.mxu1 %vm52_vm0, %v44_v30  ;;  %v394_v15 = vld [vmem:[%s1259_s2 + $0x20] sm:$0xff] }
  0x20   :  { %791 = vmatmul.mubr.msk.f32.gmra.mrb[12].mxu0 %vm52_vm0, %v31_v16  ;;  %812 = vmatmul.mubr.msk.f32.gmra.mrb[10].mxu1 %vm52_vm0, %v45_v31  ;;  %v395_v16 = vld [vmem:[%s1259_s2 + $0x28] sm:$0xff] }
  0x21   :  { %793 = vmatprep.mubr.msk.f32.mxu0 %vm52_vm0, %v32_v17  ;;  %814 = vmatprep.mubr.msk.f32.mxu1 %vm52_vm0, %v46_v32  ;;  %v396_v17 = vld [vmem:[%s1259_s2 + $0x30] sm:$0xff]  ;;  %v1017_v32 = vmov 0.0|0.0  }
  0x22   :  { %947 = vmatprep.subr.bf16.mxu1 %v1017_v32 }
  0x24   :  { %794 = vmatmul.mubr.msk.f32.gmra.mrb[14].mxu0 %vm52_vm0, %v33_v18  ;;  %815 = vmatmul.mubr.msk.f32.gmra.mrb[12].mxu1 %vm52_vm0, %v47_v33  ;;  %v397_v18 = vld [vmem:[%s1259_s2 + $0x38] sm:$0xff] }
  0x25   :  { %852 = vmatprep.mubr.f32.mxu0 %v390_v21  ;;  %817 = vmatprep.mubr.msk.f32.mxu1 %vm52_vm0, %v48_v34  ;;  %v400_v21 = vld [vmem:[%s1259_s2 + $0x50] sm:$0xff] }
  0x28   :  { %818 = vmatmul.mubr.msk.f32.gmra.mrb[14].mxu1 %vm52_vm0, %v49_v35 }
  0xdb   :  { %v774_v36 = vpop.f32.mrb[0].mxu0 }
  0xdc   :  { %v375_v37 = vmax.f32 %v774_v36, 0.0  ;;  %v215_v38 = vpop.f32.mrb[1].mxu0 }
  0xdd   :  { %v374_v39 = vmax.f32 %v215_v38, 0.0 }
  0xdf   :  { %v915_v40 = vpack.c.bf16 %v375_v37, %v374_v39  ;;  %v777_v41 = vpop.f32.mrb[2].mxu0  ;;  %v798_v27 = vpop.f32.mrb[0].mxu1 }
  0xe0   :  { %v377_v42 = vmax.f32 %v777_v41, 0.0  ;;  %v225_v43 = vpop.f32.mrb[3].mxu0  ;;  %v295_v28 = vpop.f32.mrb[1].mxu1 }
  0xe1   :  { %v376_v44 = vmax.f32 %v225_v43, 0.0  ;;  %916 = vmatprep.subr.bf16.mxu0 %v915_v40 }
  0xe2   :  { %918 = vmatpush3.bf16.msra.mxu0 %v915_v40 }
  0xe3   :  { %v919_v45 = vpack.c.bf16 %v377_v42, %v376_v44  ;;  %v780_v46 = vpop.f32.mrb[4].mxu0  ;;  %v801_v29 = vpop.f32.mrb[2].mxu1  ;;  %v1019_v44 = vmov 0.0  }
  0xe4   :  { %v379_v47 = vmax.f32 %v780_v46, 0.0  ;;  %v235_v48 = vpop.f32.mrb[5].mxu0  ;;  %v305_v30 = vpop.f32.mrb[3].mxu1  ;;  %908 = vmatprep.mubr.msk.f32.mxu1 %vm1018_vm1, %v1019_v44 }
  0xe5   :  { %v378_v49 = vmax.f32 %v235_v48, 0.0  ;;  %920 = vmatprep.subr.bf16.mxu0 %v919_v45 }
  0xe6   :  { %922 = vmatpush3.bf16.msra.mxu0 %v919_v45 }
  0xe7   :  { %v923_v50 = vpack.c.bf16 %v379_v47, %v378_v49  ;;  %v783_v51 = vpop.f32.mrb[6].mxu0  ;;  %v804_v31 = vpop.f32.mrb[4].mxu1 }
  0xe8   :  { %v381_v52 = vmax.f32 %v783_v51, 0.0  ;;  %v245_v53 = vpop.f32.mrb[7].mxu0  ;;  %v315_v33 = vpop.f32.mrb[5].mxu1 }
  0xe9   :  { %v380_v54 = vmax.f32 %v245_v53, 0.0  ;;  %924 = vmatprep.subr.bf16.mxu0 %v923_v50 }
  0xea   :  { %926 = vmatpush3.bf16.msra.mxu0 %v923_v50 }
  0xeb   :  { %v927_v55 = vpack.c.bf16 %v381_v52, %v380_v54  ;;  %v786_v56 = vpop.f32.mrb[8].mxu0  ;;  %v807_v34 = vpop.f32.mrb[6].mxu1 }
  0xec   :  { %v383_v57 = vmax.f32 %v786_v56, 0.0  ;;  %v255_v58 = vpop.f32.mrb[9].mxu0  ;;  %v325_v35 = vpop.f32.mrb[7].mxu1 }
  0xed   :  { %v382_v59 = vmax.f32 %v255_v58, 0.0  ;;  %928 = vmatprep.subr.bf16.mxu0 %v927_v55 }
  0xee   :  { %930 = vmatpush3.bf16.msra.mxu0 %v927_v55 }
  0xef   :  { %v931_v60 = vpack.c.bf16 %v383_v57, %v382_v59  ;;  %v789_v61 = vpop.f32.mrb[10].mxu0  ;;  %v810_v36 = vpop.f32.mrb[8].mxu1 }
  0xf0   :  { %v385_v62 = vmax.f32 %v789_v61, 0.0  ;;  %v265_v63 = vpop.f32.mrb[11].mxu0  ;;  %v335_v37 = vpop.f32.mrb[9].mxu1 }
  0xf1   :  { %v384_v0 = vmax.f32 %v265_v63, 0.0  ;;  %932 = vmatprep.subr.bf16.mxu0 %v931_v60 }
  0xf2   :  { %934 = vmatpush3.bf16.msra.mxu0 %v931_v60 }
  0xf3   :  { %v935_v1 = vpack.c.bf16 %v385_v62, %v384_v0  ;;  %v792_v2 = vpop.f32.mrb[12].mxu0  ;;  %v813_v38 = vpop.f32.mrb[10].mxu1 }
  0xf4   :  { %v387_v3 = vmax.f32 %v792_v2, 0.0  ;;  %v275_v4 = vpop.f32.mrb[13].mxu0  ;;  %v345_v39 = vpop.f32.mrb[11].mxu1 }
  0xf5   :  { %v386_v5 = vmax.f32 %v275_v4, 0.0  ;;  %936 = vmatprep.subr.bf16.mxu0 %v935_v1 }
  0xf6   :  { %938 = vmatpush3.bf16.msra.mxu0 %v935_v1 }
  0xf7   :  { %v939_v6 = vpack.c.bf16 %v387_v3, %v386_v5  ;;  %v795_v7 = vpop.f32.mrb[14].mxu0  ;;  %v816_v40 = vpop.f32.mrb[12].mxu1 }
  0xf8   :  { %v389_v8 = vmax.f32 %v795_v7, 0.0  ;;  %v285_v9 = vpop.f32.mrb[15].mxu0  ;;  %v355_v41 = vpop.f32.mrb[13].mxu1 }
  0xf9   :  { %v388_v10 = vmax.f32 %v285_v9, 0.0  ;;  %940 = vmatprep.subr.bf16.mxu0 %v939_v6 }
  0xfa   :  { %942 = vmatpush3.bf16.msra.mxu0 %v939_v6 }
  0xfb   :  { %v943_v11 = vpack.c.bf16 %v389_v8, %v388_v10  ;;  %v1229_v42 = vpop.f32.mrb[14].mxu1 }
  0xfc   :  { %v1231_v43 = vpop.f32.mrb[15].mxu1 }
  0xfd   :  { %944 = vmatprep.subr.bf16.mxu0 %v943_v11 }
  0xfe   :  { %946 = vmatpush3.bf16.msra.mxu0 %v943_v11 }
 0x101   :  { %853 = vmatmul.mubr.f32.vlgmr.msra.gmra.mrb[16].mxu0 %v391_v12 }
 0x102   :  { %855 = vmatprep.mubr.f32.mxu0 %v392_v13 }
 0x105   :  { %856 = vmatmul.mubr.f32.gmra.mrb[18].mxu0 %v393_v14 }
 0x106   :  { %858 = vmatprep.mubr.f32.mxu0 %v394_v15 }
 0x109   :  { %859 = vmatmul.mubr.f32.gmra.mrb[20].mxu0 %v395_v16 }
 0x10a   :  { %861 = vmatprep.mubr.f32.mxu0 %v396_v17 }
 0x10d   :  { %862 = vmatmul.mubr.f32.gmra.mrb[22].mxu0 %v397_v18 }
 0x10e   :  { %864 = vmatprep.mubr.f32.mxu0 %v398_v19 }
 0x111   :  { %865 = vmatmul.mubr.f32.gmra.mrb[24].mxu0 %v399_v20 }
 0x112   :  { %867 = vmatprep.mubr.f32.mxu0 %v400_v21 }
 0x115   :  { %868 = vmatmul.mubr.f32.gmra.mrb[26].mxu0 %v401_v22 }
 0x116   :  { %870 = vmatprep.mubr.f32.mxu0 %v402_v23 }
 0x119   :  { %871 = vmatmul.mubr.f32.gmra.mrb[28].mxu0 %v403_v24 }
 0x11a   :  { %873 = vmatprep.mubr.f32.mxu0 %v404_v25 }
 0x11d   :  { %874 = vmatmul.mubr.f32.gmra.mrb[30].mxu0 %v405_v26 }
 0x1d4   :  { %v854_v45 = vpop.f32.mrb[16].mxu0 }
 0x1d5   :  { %v478_v46 = vadd.f32 %v854_v45, %v798_v27  ;;  %v472_v47 = vpop.f32.mrb[17].mxu0 }
 0x1d6   :  { %v473_v48 = vadd.f32 %v472_v47, %v295_v28 }
 0x1d7   :  { %v552_v49 = vmax.f32 %v478_v46, 0.0 }
 0x1d8   :  { %v551_v50 = vmax.f32 %v473_v48, 0.0  ;;  %v857_v51 = vpop.f32.mrb[18].mxu0 }
 0x1d9   :  { %v488_v52 = vadd.f32 %v857_v51, %v801_v29  ;;  %v482_v53 = vpop.f32.mrb[19].mxu0 }
 0x1da   :  { %v948_v54 = vpack.c.bf16 %v552_v49, %v551_v50  ;;  %v483_v55 = vadd.f32 %v482_v53, %v305_v30 }
 0x1db   :  { %v554_v56 = vmax.f32 %v488_v52, 0.0 }
 0x1dc   :  { %v553_v57 = vmax.f32 %v483_v55, 0.0  ;;  %v860_v58 = vpop.f32.mrb[20].mxu0  ;;  %949 = vmatpush3.bf16.msra.mxu1 %v948_v54 }
 0x1dd   :  { %v498_v59 = vadd.f32 %v860_v58, %v804_v31  ;;  %v492_v60 = vpop.f32.mrb[21].mxu0  ;;  %950 = vmatprep.subr.bf16.mxu1 %v1017_v32 }
 0x1de   :  { %v951_v61 = vpack.c.bf16 %v554_v56, %v553_v57  ;;  %v493_v62 = vadd.f32 %v492_v60, %v315_v33 }
 0x1df   :  { %v556_v63 = vmax.f32 %v498_v59, 0.0 }
 0x1e0   :  { %v555_v0 = vmax.f32 %v493_v62, 0.0  ;;  %v863_v1 = vpop.f32.mrb[22].mxu0  ;;  %952 = vmatpush3.bf16.msra.mxu1 %v951_v61 }
 0x1e1   :  { %v508_v2 = vadd.f32 %v863_v1, %v807_v34  ;;  %v502_v3 = vpop.f32.mrb[23].mxu0  ;;  %953 = vmatprep.subr.bf16.mxu1 %v1017_v32 }
 0x1e2   :  { %v954_v4 = vpack.c.bf16 %v556_v63, %v555_v0  ;;  %v503_v5 = vadd.f32 %v502_v3, %v325_v35 }
 0x1e3   :  { %v558_v6 = vmax.f32 %v508_v2, 0.0 }
 0x1e4   :  { %v557_v7 = vmax.f32 %v503_v5, 0.0  ;;  %v866_v8 = vpop.f32.mrb[24].mxu0  ;;  %955 = vmatpush3.bf16.msra.mxu1 %v954_v4 }
 0x1e5   :  { %v518_v9 = vadd.f32 %v866_v8, %v810_v36  ;;  %v512_v10 = vpop.f32.mrb[25].mxu0  ;;  %956 = vmatprep.subr.bf16.mxu1 %v1017_v32 }
 0x1e6   :  { %v957_v11 = vpack.c.bf16 %v558_v6, %v557_v7  ;;  %v513_v12 = vadd.f32 %v512_v10, %v335_v37 }
 0x1e7   :  { %v560_v13 = vmax.f32 %v518_v9, 0.0 }
 0x1e8   :  { %v559_v14 = vmax.f32 %v513_v12, 0.0  ;;  %v869_v15 = vpop.f32.mrb[26].mxu0  ;;  %958 = vmatpush3.bf16.msra.mxu1 %v957_v11 }
 0x1e9   :  { %v528_v16 = vadd.f32 %v869_v15, %v813_v38  ;;  %v522_v17 = vpop.f32.mrb[27].mxu0  ;;  %959 = vmatprep.subr.bf16.mxu1 %v1017_v32  ;;  %v567_v38 = vld [vmem:[%s1260_s3] sm:$0xff] }
 0x1ea   :  { %v960_v18 = vpack.c.bf16 %v560_v13, %v559_v14  ;;  %v523_v19 = vadd.f32 %v522_v17, %v345_v39 }
 0x1eb   :  { %v562_v20 = vmax.f32 %v528_v16, 0.0 }
 0x1ec   :  { %v561_v21 = vmax.f32 %v523_v19, 0.0  ;;  %v872_v22 = vpop.f32.mrb[28].mxu0  ;;  %961 = vmatpush3.bf16.msra.mxu1 %v960_v18 }
 0x1ed   :  { %v538_v23 = vadd.f32 %v872_v22, %v816_v40  ;;  %v532_v24 = vpop.f32.mrb[29].mxu0  ;;  %962 = vmatprep.subr.bf16.mxu1 %v1017_v32 }
 0x1ee   :  { %v963_v25 = vpack.c.bf16 %v562_v20, %v561_v21  ;;  %v533_v26 = vadd.f32 %v532_v24, %v355_v41 }
 0x1ef   :  { %v564_v27 = vmax.f32 %v538_v23, 0.0 }
 0x1f0   :  { %v563_v28 = vmax.f32 %v533_v26, 0.0  ;;  %v875_v29 = vpop.f32.mrb[30].mxu0  ;;  %964 = vmatpush3.bf16.msra.mxu1 %v963_v25 }
 0x1f1   :  { %v548_v30 = vadd.f32 %v875_v29, %v1229_v42  ;;  %v542_v31 = vpop.f32.mrb[31].mxu0  ;;  %965 = vmatprep.subr.bf16.mxu1 %v1017_v32 }
 0x1f2   :  { %v966_v33 = vpack.c.bf16 %v564_v27, %v563_v28  ;;  %v543_v34 = vadd.f32 %v542_v31, %v1231_v43 }
 0x1f3   :  { %v566_v35 = vmax.f32 %v548_v30, 0.0 }
 0x1f4   :  { %v565_v36 = vmax.f32 %v543_v34, 0.0  ;;  %967 = vmatpush3.bf16.msra.mxu1 %v966_v33 }
 0x1f5   :  { %968 = vmatprep.subr.bf16.mxu1 %v1017_v32 }
 0x1f6   :  { %v969_v37 = vpack.c.bf16 %v566_v35, %v565_v36 }
 0x1f8   :  { %970 = vmatpush3.bf16.msra.mxu1 %v969_v37 }
 0x1fb   :  { %909 = vmatmul.mubr.f32.vlgmr.msra.gmra.mrb[16].mxu1 %v567_v38 }
 0x2ce   :  { %v634_v39 = vpop.f32.mrb[16].mxu1 }
 0x2cf   :  { %638 = vst [vmem:[#allocation2] sm:$0x1] %v634_v39  ;;  %v910_v40 = vpop.f32.mrb[17].mxu1 }
 0x2d0   :  { %1004 = shalt.err (!%p1001_p4)
}
 0x2d1   :  { %s1005_s12 = scalar_lea.hbm %s1261_s4, 16 }
 0x2d2   :  { %p1006_p5 = scmp.ne.s32.totalorder %s1261_s4, %s1005_s12  ;;  %p1009_p6 = scmp.lt.u32.totalorder %s1005_s12, %s1261_s4 }
 0x2d4   :  { %p1011_p7 = pnand %p1009_p6, %p1006_p5 }
 0x2d6   :  { %1014 = shalt.err (!%p1011_p7)
}
 0x2d7   :  { %648 = dma.vmem_to_hbm [thread:$0]  %s646_s7, 16, %s1261_s4, [#allocation3]  }
 0x2d8   :  { %1015 = dma.done.wait [#allocation3], 16  }
 0x2d9   :  { %1016 = vsyncadd [#allocation3], 4294967280 }
 0x2da   :  { %652 = vsyncpa [#allocation3], 1 }

</bundles_post_ra>
